<compile_context>
chip_gen: v7x
topology: tpu7x:2x2x1
jax: 0.10.0
libtpu: 0.0.40
codegen_flags: <defaults>
</compile_context>

<pallas_src>
import functools

import jax
import jax.numpy as jnp
from jax import lax
from jax.experimental import pallas as pl
from jax.experimental.pallas import tpu as pltpu


def _round_up(x, m):
    return ((x + m - 1) // m) * m


def _attention_kernel(x_ref, wq_ref, wk_ref, wv_ref, wo_ref,
                      bq_ref, bk_ref, bv_ref, bo_ref,
                      out_ref, vpure_ref,
                      acc_out, acc_vp,
                      *, num_heads, t_q, t_valid, approx_recip):
    qi = pl.program_id(1)
    h = pl.program_id(2)
    tp = x_ref.shape[1]          # padded sequence length (static)

    # ---- zero the out_proj / pure-value accumulators at the first head.
    @pl.when(h == 0)
    def _():
        acc_out[...] = jnp.zeros_like(acc_out)
        acc_vp[...] = jnp.zeros_like(acc_vp)

    x = x_ref[0]                                       # (Tp, E) bf16
    if t_q == tp:                                      # static: single q tile
        x_q = x
    else:
        start = pl.multiple_of(qi * t_q, t_q)
        x_q = x_ref[0, pl.ds(start, t_q), :]           # (TQ, E) bf16

    wq = wq_ref[0]                                     # (E, hd) bf16 (scale folded)
    wk = wk_ref[0]                                     # (E, hd) bf16
    wv = wv_ref[0]                                     # (E, hd) bf16
    wo = wo_ref[0]                                     # (hd, E) bf16

    # ---- per-head projections: deep (E-wide) contractions on the MXU,
    # bf16 operands, f32 accumulation, f32 bias add.
    q = jnp.dot(x_q, wq, preferred_element_type=jnp.float32) + bq_ref[0]  # (TQ, hd)
    k = jnp.dot(x, wk, preferred_element_type=jnp.float32) + bk_ref[0]    # (Tp, hd)
    v = jnp.dot(x, wv, preferred_element_type=jnp.float32) + bv_ref[0]    # (Tp, hd)

    # ---- scores for this head only: (TQ, Tp), bf16 operands, f32 acc.
    s = lax.dot_general(q.astype(jnp.bfloat16), k.astype(jnp.bfloat16),
                        (((1,), (1,)), ((), ())),
                        preferred_element_type=jnp.float32)

    if t_valid != tp:
        # additive key-padding bias, (1, Tp) broadcast -- no full-size iota.
        key_ids = lax.broadcasted_iota(jnp.int32, (1, tp), 1)
        s = s + jnp.where(key_ids < t_valid, jnp.float32(0.0), jnp.float32(-1e30))

    # ---- softmax with deferred normalization (f32; exp on the EUP).
    # TODO(synk): on v6e/v7x the exp could run in bf16 if the EUP becomes the
    # bottleneck; kept f32 for v5e compatibility and accuracy.
    m = jnp.max(s, axis=-1, keepdims=True)
    p = jnp.exp(s - m)                                 # (TQ, Tp) unnormalized
    l = jnp.sum(p, axis=-1, keepdims=True)             # (TQ, 1)

    ctx = jnp.dot(p.astype(jnp.bfloat16), v.astype(jnp.bfloat16),
                  preferred_element_type=jnp.float32)  # (TQ, hd)
    if approx_recip:
        ctx = ctx * pl.reciprocal(l, approx=True)      # EUP slot, ~free
    else:
        ctx = ctx / l

    # ---- fold the head-merge into the out_proj contraction:
    #   attn_out = sum_h ctx_h @ wo_h + bo ;  vpure = sum_h v_h @ wo_h + bo
    acc_out[...] += jnp.dot(ctx.astype(jnp.bfloat16), wo,
                            preferred_element_type=jnp.float32)

    if t_q == tp:
        v_q = v
    else:
        v_q = jnp.dot(x_q, wv, preferred_element_type=jnp.float32) + bv_ref[0]
    acc_vp[...] += jnp.dot(v_q.astype(jnp.bfloat16), wo,
                           preferred_element_type=jnp.float32)

    # ---- finalize on the last head: add bias, cast, store dense (TQ, E) tile.
    @pl.when(h == num_heads - 1)
    def _():
        out_ref[0] = (acc_out[...] + bo_ref[...]).astype(out_ref.dtype)
        vpure_ref[0] = (acc_vp[...] + bo_ref[...]).astype(vpure_ref.dtype)


def clip_attention_vision(hidden_states, params, *, num_heads,
                          approx_recip=True):
    """Pallas implementation of CLIPAttentionVision.forward.

    Returns (attn_output, attn_weights_reshaped=None, value_states_pure).
    """
    B, T, E = hidden_states.shape
    head_dim = E // num_heads
    assert head_dim * num_heads == E
    scale = float(head_dim) ** -0.5

    wq, bq = params["q_proj"]
    wk, bk = params["k_proj"]
    wv, bv = params["v_proj"]
    wo, bo = params["out_proj"]

    # ---- sequence padding / query tiling.
    # Tp padded to a multiple of 16 (bf16 sublane packing). For long vision
    # sequences split the query rows into two "parallel" tiles so both v7x
    # TensorCores stay busy even when B == 1.
    Tp = _round_up(max(T, 16), 16)
    if Tp > 512:
        TQ = _round_up((Tp + 1) // 2, 16)
        Tp = 2 * TQ
        QT = 2
    else:
        TQ = Tp
        QT = 1

    x = hidden_states
    if Tp != T:
        x = jnp.pad(x, ((0, 0), (0, Tp - T), (0, 0)))
    x_bf = x.astype(jnp.bfloat16)

    # ---- host-side weight prep.
    # PyTorch Linear stores W as [out, in]; transpose once, fold the attention
    # scale into q weight/bias, split into per-head slabs so the kernel only
    # ever holds per-head weight slices, and cast matmul operands to bf16.
    wq_h = jnp.transpose((wq.T * scale).reshape(E, num_heads, head_dim),
                         (1, 0, 2)).astype(jnp.bfloat16)          # (H, E, hd)
    wk_h = jnp.transpose(wk.T.reshape(E, num_heads, head_dim),
                         (1, 0, 2)).astype(jnp.bfloat16)          # (H, E, hd)
    wv_h = jnp.transpose(wv.T.reshape(E, num_heads, head_dim),
                         (1, 0, 2)).astype(jnp.bfloat16)          # (H, E, hd)
    wo_h = wo.T.reshape(num_heads, head_dim, E).astype(jnp.bfloat16)  # (H, hd, E)
    bq_h = (bq * scale).reshape(num_heads, 1, head_dim).astype(jnp.float32)
    bk_h = bk.reshape(num_heads, 1, head_dim).astype(jnp.float32)
    bv_h = bv.reshape(num_heads, 1, head_dim).astype(jnp.float32)
    bo_r = bo.reshape(1, E).astype(jnp.float32)

    kernel = functools.partial(_attention_kernel,
                               num_heads=num_heads,
                               t_q=TQ,
                               t_valid=T,
                               approx_recip=approx_recip)

    x_spec = pl.BlockSpec((1, Tp, E), lambda b, q, h: (b, 0, 0))
    wqkv_spec = pl.BlockSpec((1, E, head_dim), lambda b, q, h: (h, 0, 0))
    wo_spec = pl.BlockSpec((1, head_dim, E), lambda b, q, h: (h, 0, 0))
    bqkv_spec = pl.BlockSpec((1, 1, head_dim), lambda b, q, h: (h, 0, 0))
    bo_spec = pl.BlockSpec((1, E), lambda b, q, h: (0, 0))
    out_spec = pl.BlockSpec((1, TQ, E), lambda b, q, h: (b, q, 0))

    # ---- derived VMEM budget (cap well under v7x's 64 MiB physical VMEM).
    f32b, bf16b = 4, 2
    est = (2 * Tp * E * bf16b                       # x block (double-buffered)
           + 2 * 4 * E * head_dim * bf16b           # per-head w slices (x2 buf)
           + 2 * (3 * head_dim + E) * f32b          # biases
           + 2 * 2 * TQ * E * f32b                  # two output blocks (x2 buf)
           + 2 * TQ * E * f32b                      # two f32 accumulators
           + (TQ * Tp + 3 * Tp * head_dim + 2 * TQ * head_dim) * f32b)
    vmem_limit = int(min(48 * 1024 * 1024, max(16 * 1024 * 1024, 4 * est)))

    attn_out, vpure = pl.pallas_call(
        kernel,
        out_shape=(
            jax.ShapeDtypeStruct((B, Tp, E), hidden_states.dtype),
            jax.ShapeDtypeStruct((B, Tp, E), hidden_states.dtype),
        ),
        grid_spec=pltpu.PrefetchScalarGridSpec(
            num_scalar_prefetch=0,
            grid=(B, QT, num_heads),
            in_specs=[x_spec, wqkv_spec, wqkv_spec, wqkv_spec, wo_spec,
                      bqkv_spec, bqkv_spec, bqkv_spec, bo_spec],
            out_specs=[out_spec, out_spec],
            scratch_shapes=[
                pltpu.VMEM((TQ, E), jnp.float32),   # out_proj accumulator
                pltpu.VMEM((TQ, E), jnp.float32),   # pure-value accumulator
            ]),
        compiler_params=pltpu.CompilerParams(
            dimension_semantics=("parallel", "parallel", "arbitrary"),
            vmem_limit_bytes=vmem_limit),
    )(x_bf, wq_h, wk_h, wv_h, wo_h, bq_h, bk_h, bv_h, bo_r)

    if Tp != T:
        attn_out = attn_out[:, :T, :]
        vpure = vpure[:, :T, :]

    # TODO(synk): output_attentions=True path (materializing per-head softmax
    # weights) is not implemented; the module's default path returns None.
    return attn_out, None, vpure


def _reference(hidden_states, params, *, num_heads):
    """Pure-JAX f32 reference mirroring the PyTorch forward exactly."""
    B, T, E = hidden_states.shape
    hd = E // num_heads
    scale = float(hd) ** -0.5
    wq, bq = params["q_proj"]
    wk, bk = params["k_proj"]
    wv, bv = params["v_proj"]
    wo, bo = params["out_proj"]

    def lin(x, w, b):
        return x @ w.T + b

    q = lin(hidden_states, wq, bq) * scale
    k = lin(hidden_states, wk, bk)
    v = lin(hidden_states, wv, bv)

    def shape(t):
        return t.reshape(B, T, num_heads, hd).transpose(0, 2, 1, 3)

    qh, kh, vh = shape(q), shape(k), shape(v)                  # (B, H, T, hd)
    s = jnp.einsum("bhqd,bhkd->bhqk", qh, kh)
    p = jax.nn.softmax(s, axis=-1)
    ctx = jnp.einsum("bhqk,bhkd->bhqd", p, vh)
    ctx = ctx.transpose(0, 2, 1, 3).reshape(B, T, E)
    attn_out = lin(ctx, wo, bo)
    vpure = lin(v, wo, bo)
    return attn_out, vpure


if __name__ == "__main__":
    # Small shapes consistent with the module: hidden_size=32, heads=4.
    B, T, E, H = 2, 8, 32, 4

    key = jax.random.PRNGKey(0)
    keys = jax.random.split(key, 9)
    init = lambda k, shape: (jax.random.normal(k, shape, jnp.float32) * 0.05)

    params = {
        "q_proj": (init(keys[0], (E, E)), init(keys[1], (E,))),
        "k_proj": (init(keys[2], (E, E)), init(keys[3], (E,))),
        "v_proj": (init(keys[4], (E, E)), init(keys[5], (E,))),
        "out_proj": (init(keys[6], (E, E)), init(keys[7], (E,))),
    }
    hidden_states = jax.random.normal(keys[8], (B, T, E), jnp.float32)

    attn_out, attn_w, vpure = clip_attention_vision(
        hidden_states, params, num_heads=H)
    jax.block_until_ready(attn_out)
    jax.block_until_ready(vpure)

    ref_attn, ref_vpure = _reference(hidden_states, params, num_heads=H)
    assert attn_w is None
    # Tolerance accounts for bf16 matmul operands + approx reciprocal.
    assert jnp.allclose(attn_out, ref_attn, atol=2e-2, rtol=2e-2), "attn mismatch"
    assert jnp.allclose(vpure, ref_vpure, atol=2e-2, rtol=2e-2), "vpure mismatch"

    print("KERNEL_OK")
</pallas_src>

<mosaic_0001>
module attributes {stable_mosaic.version = 11 : i64} {
  func.func @_attention_kernel(%arg0: i32, %arg1: i32, %arg2: i32, %arg3: memref<1x16x32xbf16, #tpu.memory_space<vmem>>, %arg4: memref<1x32x8xbf16, #tpu.memory_space<vmem>>, %arg5: memref<1x32x8xbf16, #tpu.memory_space<vmem>>, %arg6: memref<1x32x8xbf16, #tpu.memory_space<vmem>>, %arg7: memref<1x8x32xbf16, #tpu.memory_space<vmem>>, %arg8: memref<1x1x8xf32, #tpu.memory_space<vmem>>, %arg9: memref<1x1x8xf32, #tpu.memory_space<vmem>>, %arg10: memref<1x1x8xf32, #tpu.memory_space<vmem>>, %arg11: memref<1x32xf32, #tpu.memory_space<vmem>>, %arg12: memref<1x16x32xf32, #tpu.memory_space<vmem>>, %arg13: memref<1x16x32xf32, #tpu.memory_space<vmem>>, %arg14: memref<16x32xf32, #tpu.memory_space<vmem>>, %arg15: memref<16x32xf32, #tpu.memory_space<vmem>>) attributes {dimension_semantics = [#tpu.dimension_semantics<parallel>, #tpu.dimension_semantics<parallel>, #tpu.dimension_semantics<arbitrary>], iteration_bounds = array<i64: 2, 1, 4>, scalar_prefetch = 0 : i64, scratch_operands = 2 : i64, tpu.core_type = #tpu.core_type<tc>, window_params = [{transform_indices = @transform_0, window_bounds = array<i64: 1, 16, 32>}, {transform_indices = @transform_1, window_bounds = array<i64: 1, 32, 8>}, {transform_indices = @transform_2, window_bounds = array<i64: 1, 32, 8>}, {transform_indices = @transform_3, window_bounds = array<i64: 1, 32, 8>}, {transform_indices = @transform_4, window_bounds = array<i64: 1, 8, 32>}, {transform_indices = @transform_5, window_bounds = array<i64: 1, 1, 8>}, {transform_indices = @transform_6, window_bounds = array<i64: 1, 1, 8>}, {transform_indices = @transform_7, window_bounds = array<i64: 1, 1, 8>}, {pipeline_mode = #tpu.pipeline_mode<synchronous>, transform_indices = @transform_8, window_bounds = array<i64: 1, 32>}, {transform_indices = @transform_9, window_bounds = array<i64: 1, 16, 32>}, {transform_indices = @transform_10, window_bounds = array<i64: 1, 16, 32>}]} {
    %c0_i32 = arith.constant 0 : i32
    %0 = arith.cmpi eq, %arg2, %c0_i32 : i32
    %1 = arith.extui %0 : i1 to i32
    %c0_i32_0 = arith.constant 0 : i32
    %2 = arith.cmpi ne, %1, %c0_i32_0 : i32
    scf.if %2 {
      %cst_43 = arith.constant 0.000000e+00 : f32
      %65 = vector.broadcast %cst_43 : f32 to vector<16x32xf32>
      %c0_44 = arith.constant 0 : index
      %c0_45 = arith.constant 0 : index
      %66 = vector.load %arg14[%c0_44, %c0_45] : memref<16x32xf32, #tpu.memory_space<vmem>>, vector<16x32xf32>
      tpu.vector_store %arg14[%c0_44, %c0_45], %65 {strides = array<i32>} : memref<16x32xf32, #tpu.memory_space<vmem>>, vector<16x32xf32>,
      %cst_46 = arith.constant 0.000000e+00 : f32
      %67 = vector.broadcast %cst_46 : f32 to vector<16x32xf32>
      %c0_47 = arith.constant 0 : index
      %c0_48 = arith.constant 0 : index
      %68 = vector.load %arg15[%c0_47, %c0_48] : memref<16x32xf32, #tpu.memory_space<vmem>>, vector<16x32xf32>
      tpu.vector_store %arg15[%c0_47, %c0_48], %67 {strides = array<i32>} : memref<16x32xf32, #tpu.memory_space<vmem>>, vector<16x32xf32>,
    } else {
    }
    %c0 = arith.constant 0 : index
    %c0_1 = arith.constant 0 : index
    %c0_2 = arith.constant 0 : index
    %3 = vector.load %arg3[%c0, %c0_1, %c0_2] : memref<1x16x32xbf16, #tpu.memory_space<vmem>>, vector<1x16x32xbf16>
    %4 = vector.shape_cast %3 : vector<1x16x32xbf16> to vector<16x32xbf16>
    %c0_3 = arith.constant 0 : index
    %c0_4 = arith.constant 0 : index
    %c0_5 = arith.constant 0 : index
    %5 = vector.load %arg4[%c0_3, %c0_4, %c0_5] : memref<1x32x8xbf16, #tpu.memory_space<vmem>>, vector<1x32x8xbf16>
    %6 = vector.shape_cast %5 : vector<1x32x8xbf16> to vector<32x8xbf16>
    %c0_6 = arith.constant 0 : index
    %c0_7 = arith.constant 0 : index
    %c0_8 = arith.constant 0 : index
    %7 = vector.load %arg5[%c0_6, %c0_7, %c0_8] : memref<1x32x8xbf16, #tpu.memory_space<vmem>>, vector<1x32x8xbf16>
    %8 = vector.shape_cast %7 : vector<1x32x8xbf16> to vector<32x8xbf16>
    %c0_9 = arith.constant 0 : index
    %c0_10 = arith.constant 0 : index
    %c0_11 = arith.constant 0 : index
    %9 = vector.load %arg6[%c0_9, %c0_10, %c0_11] : memref<1x32x8xbf16, #tpu.memory_space<vmem>>, vector<1x32x8xbf16>
    %10 = vector.shape_cast %9 : vector<1x32x8xbf16> to vector<32x8xbf16>
    %c0_12 = arith.constant 0 : index
    %c0_13 = arith.constant 0 : index
    %c0_14 = arith.constant 0 : index
    %11 = vector.load %arg7[%c0_12, %c0_13, %c0_14] : memref<1x8x32xbf16, #tpu.memory_space<vmem>>, vector<1x8x32xbf16>
    %12 = vector.shape_cast %11 : vector<1x8x32xbf16> to vector<8x32xbf16>
    %cst = arith.constant dense<0.000000e+00> : vector<16x8xf32>
    %13 = tpu.matmul %4, %6, %cst {dimension_numbers = #tpu.dot_dimension_numbers<[1], [0], [0], [1], [0, 0, 1, 1], [], []>} : vector<16x32xbf16>, vector<32x8xbf16>, vector<16x8xf32> -> vector<16x8xf32>
    %c0_15 = arith.constant 0 : index
    %c0_16 = arith.constant 0 : index
    %c0_17 = arith.constant 0 : index
    %14 = vector.load %arg8[%c0_15, %c0_16, %c0_17] : memref<1x1x8xf32, #tpu.memory_space<vmem>>, vector<1x1x8xf32>
    %15 = vector.shape_cast %14 : vector<1x1x8xf32> to vector<1x8xf32>
    %16 = vector.broadcast %15 : vector<1x8xf32> to vector<16x8xf32>
    %17 = arith.addf %13, %16 : vector<16x8xf32>
    %cst_18 = arith.constant dense<0.000000e+00> : vector<16x8xf32>
    %18 = tpu.matmul %4, %8, %cst_18 {dimension_numbers = #tpu.dot_dimension_numbers<[1], [0], [0], [1], [0, 0, 1, 1], [], []>} : vector<16x32xbf16>, vector<32x8xbf16>, vector<16x8xf32> -> vector<16x8xf32>
    %c0_19 = arith.constant 0 : index
    %c0_20 = arith.constant 0 : index
    %c0_21 = arith.constant 0 : index
    %19 = vector.load %arg9[%c0_19, %c0_20, %c0_21] : memref<1x1x8xf32, #tpu.memory_space<vmem>>, vector<1x1x8xf32>
    %20 = vector.shape_cast %19 : vector<1x1x8xf32> to vector<1x8xf32>
    %21 = vector.broadcast %20 : vector<1x8xf32> to vector<16x8xf32>
    %22 = arith.addf %18, %21 : vector<16x8xf32>
    %cst_22 = arith.constant dense<0.000000e+00> : vector<16x8xf32>
    %23 = tpu.matmul %4, %10, %cst_22 {dimension_numbers = #tpu.dot_dimension_numbers<[1], [0], [0], [1], [0, 0, 1, 1], [], []>} : vector<16x32xbf16>, vector<32x8xbf16>, vector<16x8xf32> -> vector<16x8xf32>
    %c0_23 = arith.constant 0 : index
    %c0_24 = arith.constant 0 : index
    %c0_25 = arith.constant 0 : index
    %24 = vector.load %arg10[%c0_23, %c0_24, %c0_25] : memref<1x1x8xf32, #tpu.memory_space<vmem>>, vector<1x1x8xf32>
    %25 = vector.shape_cast %24 : vector<1x1x8xf32> to vector<1x8xf32>
    %26 = vector.broadcast %25 : vector<1x8xf32> to vector<16x8xf32>
    %27 = arith.addf %23, %26 : vector<16x8xf32>
    %28 = arith.truncf %17 : vector<16x8xf32> to vector<16x8xbf16>
    %29 = arith.truncf %22 : vector<16x8xf32> to vector<16x8xbf16>
    %cst_26 = arith.constant dense<0.000000e+00> : vector<16x16xf32>
    %30 = tpu.matmul %28, %29, %cst_26 {dimension_numbers = #tpu.dot_dimension_numbers<[1], [1], [0], [0], [0, 0, 1, 0], [], []>} : vector<16x8xbf16>, vector<16x8xbf16>, vector<16x16xf32> -> vector<16x16xf32>
    %31 = tpu.iota {dimensions = array<i32: 1>} : vector<1x16xi32>
    %c8_i32 = arith.constant 8 : i32
    %32 = vector.broadcast %c8_i32 : i32 to vector<1x16xi32>
    %33 = arith.cmpi slt, %31, %32 : vector<1x16xi32>
    %cst_27 = arith.constant 0.000000e+00 : f32
    %cst_28 = arith.constant -1.000000e+30 : f32
    %34 = vector.broadcast %cst_27 : f32 to vector<1x16xf32>
    %35 = vector.broadcast %cst_28 : f32 to vector<1x16xf32>
    %36 = arith.select %33, %34, %35 : vector<1x16xi1>, vector<1x16xf32>
    %37 = vector.broadcast %36 : vector<1x16xf32> to vector<16x16xf32>
    %38 = arith.addf %30, %37 : vector<16x16xf32>
    %cst_29 = arith.constant dense<0xFF800000> : vector<16xf32>
    %39 = vector.multi_reduction <maximumf>, %38, %cst_29 [1] : vector<16x16xf32> to vector<16xf32>
    %40 = vector.shape_cast %39 : vector<16xf32> to vector<16x1xf32>
    %41 = vector.broadcast %40 : vector<16x1xf32> to vector<16x16xf32>
    %42 = arith.subf %38, %41 : vector<16x16xf32>
    %43 = math.exp %42 : vector<16x16xf32>
    %cst_30 = arith.constant dense<0.000000e+00> : vector<16xf32>
    %44 = vector.multi_reduction <add>, %43, %cst_30 [1] : vector<16x16xf32> to vector<16xf32>
    %45 = vector.shape_cast %44 : vector<16xf32> to vector<16x1xf32>
    %46 = arith.truncf %43 : vector<16x16xf32> to vector<16x16xbf16>
    %47 = arith.truncf %27 : vector<16x8xf32> to vector<16x8xbf16>
    %cst_31 = arith.constant dense<0.000000e+00> : vector<16x8xf32>
    %48 = tpu.matmul %46, %47, %cst_31 {dimension_numbers = #tpu.dot_dimension_numbers<[1], [0], [0], [1], [0, 0, 1, 1], [], []>} : vector<16x16xbf16>, vector<16x8xbf16>, vector<16x8xf32> -> vector<16x8xf32>
    %49 = tpu.reciprocal %45 {approx = true} : vector<16x1xf32> -> vector<16x1xf32>
    %50 = vector.broadcast %49 : vector<16x1xf32> to vector<16x8xf32>
    %51 = arith.mulf %48, %50 : vector<16x8xf32>
    %c0_32 = arith.constant 0 : index
    %c0_33 = arith.constant 0 : index
    %52 = vector.load %arg14[%c0_32, %c0_33] : memref<16x32xf32, #tpu.memory_space<vmem>>, vector<16x32xf32>
    %53 = arith.truncf %51 : vector<16x8xf32> to vector<16x8xbf16>
    %cst_34 = arith.constant dense<0.000000e+00> : vector<16x32xf32>
    %54 = tpu.matmul %53, %12, %cst_34 {dimension_numbers = #tpu.dot_dimension_numbers<[1], [0], [0], [1], [0, 0, 1, 1], [], []>} : vector<16x8xbf16>, vector<8x32xbf16>, vector<16x32xf32> -> vector<16x32xf32>
    %55 = arith.addf %52, %54 : vector<16x32xf32>
    %c0_35 = arith.constant 0 : index
    %c0_36 = arith.constant 0 : index
    %56 = vector.load %arg14[%c0_35, %c0_36] : memref<16x32xf32, #tpu.memory_space<vmem>>, vector<16x32xf32>
    tpu.vector_store %arg14[%c0_35, %c0_36], %55 {strides = array<i32>} : memref<16x32xf32, #tpu.memory_space<vmem>>, vector<16x32xf32>,
    %c0_37 = arith.constant 0 : index
    %c0_38 = arith.constant 0 : index
    %57 = vector.load %arg15[%c0_37, %c0_38] : memref<16x32xf32, #tpu.memory_space<vmem>>, vector<16x32xf32>
    %58 = arith.truncf %27 : vector<16x8xf32> to vector<16x8xbf16>
    %cst_39 = arith.constant dense<0.000000e+00> : vector<16x32xf32>
    %59 = tpu.matmul %58, %12, %cst_39 {dimension_numbers = #tpu.dot_dimension_numbers<[1], [0], [0], [1], [0, 0, 1, 1], [], []>} : vector<16x8xbf16>, vector<8x32xbf16>, vector<16x32xf32> -> vector<16x32xf32>
    %60 = arith.addf %57, %59 : vector<16x32xf32>
    %c0_40 = arith.constant 0 : index
    %c0_41 = arith.constant 0 : index
    %61 = vector.load %arg15[%c0_40, %c0_41] : memref<16x32xf32, #tpu.memory_space<vmem>>, vector<16x32xf32>
    tpu.vector_store %arg15[%c0_40, %c0_41], %60 {strides = array<i32>} : memref<16x32xf32, #tpu.memory_space<vmem>>, vector<16x32xf32>,
    %c3_i32 = arith.constant 3 : i32
    %62 = arith.cmpi eq, %arg2, %c3_i32 : i32
    %63 = arith.extui %62 : i1 to i32
    %c0_i32_42 = arith.constant 0 : i32
    %64 = arith.cmpi ne, %63, %c0_i32_42 : i32
    scf.if %64 {
      %c0_43 = arith.constant 0 : index
      %c0_44 = arith.constant 0 : index
      %65 = vector.load %arg14[%c0_43, %c0_44] : memref<16x32xf32, #tpu.memory_space<vmem>>, vector<16x32xf32>
      %c0_45 = arith.constant 0 : index
      %c0_46 = arith.constant 0 : index
      %66 = vector.load %arg11[%c0_45, %c0_46] : memref<1x32xf32, #tpu.memory_space<vmem>>, vector<1x32xf32>
      %67 = vector.broadcast %66 : vector<1x32xf32> to vector<16x32xf32>
      %68 = arith.addf %65, %67 : vector<16x32xf32>
      %c0_47 = arith.constant 0 : index
      %c0_48 = arith.constant 0 : index
      %c0_49 = arith.constant 0 : index
      %69 = vector.load %arg12[%c0_47, %c0_48, %c0_49] : memref<1x16x32xf32, #tpu.memory_space<vmem>>, vector<1x16x32xf32>
      %70 = vector.shape_cast %69 : vector<1x16x32xf32> to vector<16x32xf32>
      %71 = vector.shape_cast %68 : vector<16x32xf32> to vector<1x16x32xf32>
      tpu.vector_store %arg12[%c0_47, %c0_48, %c0_49], %71 {strides = array<i32>} : memref<1x16x32xf32, #tpu.memory_space<vmem>>, vector<1x16x32xf32>,
      %c0_50 = arith.constant 0 : index
      %c0_51 = arith.constant 0 : index
      %72 = vector.load %arg15[%c0_50, %c0_51] : memref<16x32xf32, #tpu.memory_space<vmem>>, vector<16x32xf32>
      %c0_52 = arith.constant 0 : index
      %c0_53 = arith.constant 0 : index
      %73 = vector.load %arg11[%c0_52, %c0_53] : memref<1x32xf32, #tpu.memory_space<vmem>>, vector<1x32xf32>
      %74 = vector.broadcast %73 : vector<1x32xf32> to vector<16x32xf32>
      %75 = arith.addf %72, %74 : vector<16x32xf32>
      %c0_54 = arith.constant 0 : index
      %c0_55 = arith.constant 0 : index
      %c0_56 = arith.constant 0 : index
      %76 = vector.load %arg13[%c0_54, %c0_55, %c0_56] : memref<1x16x32xf32, #tpu.memory_space<vmem>>, vector<1x16x32xf32>
      %77 = vector.shape_cast %76 : vector<1x16x32xf32> to vector<16x32xf32>
      %78 = vector.shape_cast %75 : vector<16x32xf32> to vector<1x16x32xf32>
      tpu.vector_store %arg13[%c0_54, %c0_55, %c0_56], %78 {strides = array<i32>} : memref<1x16x32xf32, #tpu.memory_space<vmem>>, vector<1x16x32xf32>,
    } else {
    }
    return
  }
  func.func @transform_0(%arg0: i32, %arg1: i32, %arg2: i32) -> (i32, i32, i32) {
    %c0_i32 = arith.constant 0 : i32
    %c0_i32_0 = arith.constant 0 : i32
    %c0_i32_1 = arith.constant 0 : i32
    return %arg0, %c0_i32, %c0_i32_0 : i32, i32, i32
  }
  func.func @transform_1(%arg0: i32, %arg1: i32, %arg2: i32) -> (i32, i32, i32) {
    %c0_i32 = arith.constant 0 : i32
    %c0_i32_0 = arith.constant 0 : i32
    %c0_i32_1 = arith.constant 0 : i32
    return %arg2, %c0_i32, %c0_i32_0 : i32, i32, i32
  }
  func.func @transform_2(%arg0: i32, %arg1: i32, %arg2: i32) -> (i32, i32, i32) {
    %c0_i32 = arith.constant 0 : i32
    %c0_i32_0 = arith.constant 0 : i32
    %c0_i32_1 = arith.constant 0 : i32
    return %arg2, %c0_i32, %c0_i32_0 : i32, i32, i32
  }
  func.func @transform_3(%arg0: i32, %arg1: i32, %arg2: i32) -> (i32, i32, i32) {
    %c0_i32 = arith.constant 0 : i32
    %c0_i32_0 = arith.constant 0 : i32
    %c0_i32_1 = arith.constant 0 : i32
    return %arg2, %c0_i32, %c0_i32_0 : i32, i32, i32
  }
  func.func @transform_4(%arg0: i32, %arg1: i32, %arg2: i32) -> (i32, i32, i32) {
    %c0_i32 = arith.constant 0 : i32
    %c0_i32_0 = arith.constant 0 : i32
    %c0_i32_1 = arith.constant 0 : i32
    return %arg2, %c0_i32, %c0_i32_0 : i32, i32, i32
  }
  func.func @transform_5(%arg0: i32, %arg1: i32, %arg2: i32) -> (i32, i32, i32) {
    %c0_i32 = arith.constant 0 : i32
    %c0_i32_0 = arith.constant 0 : i32
    %c0_i32_1 = arith.constant 0 : i32
    return %arg2, %c0_i32, %c0_i32_0 : i32, i32, i32
  }
  func.func @transform_6(%arg0: i32, %arg1: i32, %arg2: i32) -> (i32, i32, i32) {
    %c0_i32 = arith.constant 0 : i32
    %c0_i32_0 = arith.constant 0 : i32
    %c0_i32_1 = arith.constant 0 : i32
    return %arg2, %c0_i32, %c0_i32_0 : i32, i32, i32
  }
  func.func @transform_7(%arg0: i32, %arg1: i32, %arg2: i32) -> (i32, i32, i32) {
    %c0_i32 = arith.constant 0 : i32
    %c0_i32_0 = arith.constant 0 : i32
    %c0_i32_1 = arith.constant 0 : i32
    return %arg2, %c0_i32, %c0_i32_0 : i32, i32, i32
  }
  func.func @transform_8(%arg0: i32, %arg1: i32, %arg2: i32) -> (i32, i32) {
    %c0_i32 = arith.constant 0 : i32
    %c0_i32_0 = arith.constant 0 : i32
    %c0_i32_1 = arith.constant 0 : i32
    return %c0_i32, %c0_i32_0 : i32, i32
  }
  func.func @transform_9(%arg0: i32, %arg1: i32, %arg2: i32) -> (i32, i32, i32) {
    %c0_i32 = arith.constant 0 : i32
    %c0_i32_0 = arith.constant 0 : i32
    return %arg0, %arg1, %c0_i32 : i32, i32, i32
  }
  func.func @transform_10(%arg0: i32, %arg1: i32, %arg2: i32) -> (i32, i32, i32) {
    %c0_i32 = arith.constant 0 : i32
    %c0_i32_0 = arith.constant 0 : i32
    return %arg0, %arg1, %c0_i32 : i32, i32, i32
  }
}

</mosaic_0001>

<bundles_post_ra>
// kernel: tpu_custom_call.1
= control target key start
LH: loop header
LB: loop body
LE: loop exit
PB: predicated region body
PF: predicated region fallthrough
CT: control target
= control target key end

     0   :  { %s1914_s0 = inlined_call_operand.vmem [shape: bf16[2,16,32], index: 0, kind: input, shape index: {}]   ;;  %s1915_s1 = inlined_call_operand.vmem [shape: bf16[4,32,8], index: 1, kind: input, shape index: {}]   ;;  %s1916_s2 = inlined_call_operand.vmem [shape: bf16[4,32,8], index: 2, kind: input, shape index: {}]   ;;  %s1917_s3 = inlined_call_operand.vmem [shape: bf16[4,32,8], index: 3, kind: input, shape index: {}]   ;;  %s1918_s4 = inlined_call_operand.vmem [shape: bf16[4,8,32], index: 4, kind: input, shape index: {}]   ;;  %s1919_s5 = inlined_call_operand.vmem [shape: f32[4,1,8], index: 5, kind: input, shape index: {}]   ;;  %s1920_s6 = inlined_call_operand.vmem [shape: f32[4,1,8], index: 6, kind: input, shape index: {}]   ;;  %s1921_s7 = inlined_call_operand.vmem [shape: f32[4,1,8], index: 7, kind: input, shape index: {}]   ;;  %s1922_s8 = inlined_call_operand.vmem [shape: f32[1,32], index: 8, kind: input, shape index: {}]   ;;  %s1923_s9 = inlined_call_operand.hbm [shape: f32[2,16,32], index: 9, kind: output, shape index: {0}]   ;;  %s1924_s10 = inlined_call_operand.hbm [shape: f32[2,16,32], index: 10, kind: output, shape index: {1}]  }
   0x1   :  { %1936 = sst [smem:[#allocation20_spill]] %s1914_s0 }
   0x2   :  { %1937 = sst [smem:[#allocation21_spill]] %s1915_s1 }
   0x3   :  { %1938 = sst [smem:[#allocation22_spill]] %s1916_s2 }
   0x4   :  { %1939 = sst [smem:[#allocation23_spill]] %s1923_s9 }
   0x5   :  { %1940 = sst [smem:[#allocation24_spill]] %s1924_s10 }
   0x6   :  { %16 = vsyncpa [#allocation5], 0 }
   0x7   :  { %18 = vsyncpa [#allocation5 + $0x1], 0 }
   0x8   :  { %19 = vsyncpa [#allocation7], 0 }
   0x9   :  { %21 = vsyncpa [#allocation7 + $0x1], 0  ;;  %s1617_s13 = smov 0   ;;  %s1619_s14 = smov 0  }
   0xa   :  { %s1621_s15 = smov 0   ;;  %s1623_s16 = smov 0  }
   0xb   :  { %s1625_s17 = smov 0   ;;  %s1627_s18 = smov 0  }
   0xc   :  { %s1629_s19 = smov 0   ;;  %s1631_s20 = smov 0  }
   0xd LB: > { %1941 = sst [smem:[#allocation10_spill]] %s1524_s13  ;;  %s1213_s21 = sadd.s32 4294967295, %s1552_s20   ;;  %s1552_s20 = sphi %s1631_s20, %s27_s20   ;;  %s1548_s19 = sphi %s1629_s19, %s1967_s19   ;;  %s1544_s18 = sphi %s1627_s18, %s1966_s18   ;;  %s1540_s17 = sphi %s1625_s17, %s1965_s17   ;;  %s1536_s16 = sphi %s1623_s16, %s1964_s16   ;;  %s1532_s15 = sphi %s1621_s15, %s1963_s15   ;;  %s1528_s14 = sphi %s1619_s14, %s1962_s14   ;;  %s1524_s13 = sphi %s1617_s13, %s1961_s13  }
   0xe   : > { %1942 = sst [smem:[#allocation11_spill]] %s1528_s14  ;;  %s1214_s22 = sadd.s32 4294967294, %s1552_s20  }
   0xf   : > { %1943 = sst [smem:[#allocation12_spill]] %s1532_s15  ;;  %s39_s23 = sadd.s32 1, %s1544_s18 }
  0x10   : > { %1944 = sst [smem:[#allocation13_spill]] %s1544_s18  ;;  %p40_p0 = scmp.ge.s32.totalorder %s39_s23, 4 }
  0x11   : > { %1945 = sst [smem:[#allocation14_spill]] %s1548_s19  ;;  %s46_s24 = sadd.s32 1, %s1548_s19 }
  0x12   : > { %1946 = sst [smem:[#allocation15_spill]] %s1552_s20  ;;  %p294_p1 = scmp.ne.s32.totalorder %s1532_s15, %s1528_s14 }
  0x13   : > { %p295_p2 = scmp.eq.s32.totalorder %s1213_s21, 7  ;;  %s1969_s23 = smov (%p40_p0, %s39_s23), 0 }
  0x14   : > { %1947 = sst [smem:[#allocation16_spill]] %s1969_s23  ;;  %s1971_s24 = smov (!%p40_p0, %s46_s24), %s1548_s19 }
  0x15   : > { %p1666_p3 = por %p295_p2, %p294_p1  ;;  %p300_p4 = scmp.ne.s32.totalorder %s1528_s14, %s1524_s13 }
  0x16   : > { %p48_p5 = scmp.ge.s32.totalorder %s1971_s24, 2  ;;  %p301_p6 = scmp.eq.s32.totalorder %s1214_s22, 7 }
  0x17   : > { %p1217_p7 = scmp.ge.s32.totalorder %s1552_s20, 1  ;;  %p407_p8 = scmp.lt.s32.totalorder %s1552_s20, 9 }
  0x18   : > { %s1973_s24 = smov (%p48_p5, %s1971_s24), 0  ;;  %p1676_p9 = por %p301_p6, %p300_p4 }
  0x19   : > { %1949 = sst [smem:[#allocation17_spill]] %s1973_s24  ;;  %p408_p10 = pnand %p1217_p7, %p407_p8 }
  0x1a   : > { %s1950_s26 = scalar_select %p1676_p9, 1, 0 }
  0x1b   : > { %s279_s27 = ssub.s32 %s1548_s19, %s1973_s24  ;;  %s284_s28 = sadd.s32 1, %s1532_s15 }
  0x1c   : > { %1951 = sst [smem:[#allocation18_spill]] %s1950_s26  ;;  %p282_p11 = scmp.eq.s32.totalorder %s279_s27, 0 }
  0x1d   : > { %411 = sbr.rel (%p408_p10) target bundleno = 1152 (0x480), region = 56  ;;  %s1687_s30 = sand.u32 (!%p408_p10), 1, %s1528_s14  }
  0x1e   : > { %s1684_s29 = scalar_select %p282_p11, %s1532_s15, %s284_s28  }
  0x1f   : > { %p478_p12 = scmp.lt.s32.totalorder (!%p408_p10), %s1540_s17, 1  ;;  %s1218_s11 = sshll.u32 (!%p408_p10), %s1687_s30, 4 }
  0x20   : > { %1952 = sst [smem:[#allocation19_spill]] %s1684_s29  ;;  %p483_p13 = scmp.lt.s32.totalorder (!%p408_p10), %s1536_s16, 3 }
  0x21   : > { %s1953_s0 = sld [smem:[#allocation20_spill]] (!%p408_p10)  ;;  %s1954_s1 = sld [smem:[#allocation21_spill]] (!%p408_p10) }
  0x22   : > { %s1955_s2 = sld [smem:[#allocation22_spill]] (!%p408_p10)  ;;  %s1733_s20 = scalar_lea.vmem (!%p408_p10), [#allocation4], %s1218_s11 }
  0x23   : > { %p1229_p0 = scmp.ne.s32.totalorder (!%p408_p10), %s1536_s16, 0 }
  0x24   : > { %s479_s12 = scalar_select %p478_p12, %s1540_s17, 1 }
  0x25   : > { %s1694_s21 = scalar_select %p483_p13, %s1536_s16, 3 }
  0x26   : > { %s1258_s22 = sshll.u32 %s479_s12, 3  ;;  %517 = sbr.rel (%p1229_p0) target bundleno = 45 (0x2d), region = 60  ;;  %vm518_vm0 = vcmask (!%p1229_p0), 261120   ;;  %v1554_v0 = vmov (!%p1229_p0), 0.0  }
  0x27   : > { %s1699_s24 = scalar_lea.vmem %s1953_s0, %s1258_s22  ;;  %s1259_s23 = sshll.u32 %s1694_s21, 4  ;;  %519 = vst.msk [vmem:[#allocation2] sm:$0xff] (!%p1229_p0), %vm518_vm0, %v1554_v0  ;;  %520 = vst.msk [vmem:[#allocation2 + $0x8] sm:$0xff] (!%p1229_p0), %vm518_vm0, %v1554_v0 }
  0x28   : > { %s1705_s29 = scalar_lea.vmem %s1954_s1, %s1259_s23  ;;  %s492_s26 = scalar_lea.vmem %s1955_s2, %s1259_s23  ;;  %521 = vst.msk [vmem:[#allocation3] sm:$0xff] (!%p1229_p0), %vm518_vm0, %v1554_v0  ;;  %522 = vst.msk [vmem:[#allocation3 + $0x8] sm:$0xff] (!%p1229_p0), %vm518_vm0, %v1554_v0 }
  0x29   : > { %s1713_s10 = scalar_lea.vmem %s1917_s3, %s1259_s23  ;;  %s1228_s12 = sshll.u32 %s1694_s21, 2 }
  0x2a   : > { %s1719_s22 = scalar_lea.vmem %s1918_s4, %s1228_s12  ;;  %s504_s18 = scalar_lea.vmem %s1919_s5, %s1694_s21 }
  0x2b   : > { %s507_s14 = scalar_lea.vmem %s1920_s6, %s1694_s21  ;;  %s510_s13 = scalar_lea.vmem %s1921_s7, %s1694_s21 }
  0x2c   : > { %s1735_s23 = scalar_lea.vmem [#allocation6], %s1218_s11 }
  0x2d PF: > { %v1411_v1 = vld [vmem:[%s492_s26] sm:$0xff]   ;;  %v1555_v2 = vmov 0.0   ;;  %v1412_v3 = vld [vmem:[%s492_s26 + $0x8] sm:$0xff]   ;;  %vm1556_vm1 = vmmov 0   ;;  %vm562_vm2 = vcmask 261120   ;;  %vm733_vm3 = vcmask 64512  }
  0x2e   : > { %1289 = vmatprep.subr.bf16.mxu1 %v1555_v2  ;;  %1281 = vmatprep.subr.bf16.mxu0 %v1555_v2  ;;  %v1413_v4 = vld [vmem:[%s1705_s29] sm:$0xff]   ;;  %v1415_v5 = vld [vmem:[%s1705_s29 + $0x8] sm:$0xff]   ;;  %v729_v26 = vlaneseq  ;;  %v1557_v28 = vmov -1e+30   ;;  %vm781_vm5 = vcmask 130048   ;;  %vm856_vm6 = vcmask 1043456  }
  0x2f   : > { %1290 = vmatpush3.bf16.msra.mxu1 %v1411_v1  ;;  %1293 = vmatprep.mubr.msk.bf16.mxu1 %vm1556_vm1, %v1555_v2  ;;  %v1414_v6 = vld [vmem:[%s1699_s24] sm:$0xff]   ;;  %v1417_v8 = vld [vmem:[%s1713_s10 + $0x8] sm:$0xff]   ;;  %p1247_p1 = scmp.ne.s32.totalorder %s1536_s16, 3 }
  0x30   : > { %1291 = vmatprep.subr.bf16.mxu1 %v1555_v2  ;;  %1285 = vmatprep.mubr.msk.bf16.mxu0 %vm1556_vm1, %v1555_v2  ;;  %v1416_v7 = vld [vmem:[%s1713_s10] sm:$0xff]   ;;  %v730_v27 = vand.u32 127, %v729_v26 }
  0x31   : > { %1282 = vmatpush3.bf16.msra.mxu0 %v1413_v4  ;;  %v1235_v9 = vld [vmem:[%s507_s14] ss:$0 sm:$0xff] }
  0x32   : > { %1283 = vmatprep.subr.bf16.mxu0 %v1555_v2  ;;  %v1230_v11 = vld [vmem:[%s504_s18] ss:$0 sm:$0xff]  ;;  %vm731_vm4 = vcmp.lt.s32.totalorder %v730_v27, 8 }
  0x33   : > { %1292 = vmatpush3.bf16.msra.mxu1 %v1412_v3  ;;  %v732_v29 = vsel %vm731_vm4, 0.0, %v1557_v28  ;;  %v1239_v38 = vld [vmem:[%s510_s13] ss:$0 sm:$0xff] }
  0x34   : > { %1305 = vmatprep.subr.bf16.mxu1 %v1555_v2  ;;  %v537_v46 = vld [vmem:[%s1719_s22] sm:$0xf] }
  0x35   : > { %1284 = vmatpush3.bf16.msra.mxu0 %v1415_v5  ;;  %v858_v47 = vsel %vm856_vm6, %v537_v46, 0 }
  0x36   : > { %1294 = vmatmul.mubr.msk.bf16.vlgmr.msra.gmra.mrb[0].mxu1 %vm562_vm2, %v1414_v6  ;;  %1297 = vmatprep.subr.bf16.mxu0 %v1555_v2 }
  0x37   : > { %1307 = vmatprep.mubr.msk.bf16.mxu1 %vm1556_vm1, %v1555_v2 }
  0x38   : > { %1286 = vmatmul.mubr.msk.bf16.vlgmr.msra.gmra.mrb[0].mxu0 %vm562_vm2, %v1414_v6 }
  0x39   : > { %1301 = vmatprep.mubr.msk.bf16.mxu0 %vm1556_vm1, %v1555_v2  ;;  %1298 = vmatpush3.bf16.msra.mxu0 %v1416_v7  ;;  %v905_v7 = vld [vmem:[#allocation3] sm:$0xff] }
  0x3a   : > { %1299 = vmatprep.subr.bf16.mxu0 %v1555_v2 }
  0x3d   : > { %1300 = vmatpush3.bf16.msra.mxu0 %v1417_v8 }
  0x3e   : > { %1311 = vmatprep.subr.bf16.mxu0 %v1555_v2 }
  0x40   : > { %1302 = vmatmul.mubr.msk.bf16.vlgmr.msra.gmra.mrb[4].mxu0 %vm562_vm2, %v1414_v6 }
  0x41   : > { %1313 = vmatprep.mubr.msk.bf16.mxu0 %vm1556_vm1, %v1555_v2 }
 0x109   : > { %v660_v10 = vpop.f32.mrb[0].mxu1 }
 0x10a   : > { %v1295_v12 = vpop.f32.mrb[1].mxu1  ;;  %v661_v15 = vadd.f32 %v1235_v9, %v660_v10 }
 0x10b   : > { %v663_v13 = vpop.f32.mrb[2].mxu1  ;;  %v600_v14 = vpop.f32.mrb[0].mxu0 }
 0x10c   : > { %v664_v16 = vadd.f32 %v1235_v9, %v663_v13  ;;  %v1296_v17 = vpop.f32.mrb[3].mxu1  ;;  %v601_v18 = vadd.f32 %v1230_v11, %v600_v14  ;;  %v1287_v19 = vpop.f32.mrb[1].mxu0  ;;  %v850_v14 = vld [vmem:[#allocation2] sm:$0xff] }
 0x10d   : > { %v603_v20 = vpop.f32.mrb[2].mxu0 }
 0x10e   : > { %v728_v21 = vpack.c.bf16 %v664_v16, %v661_v15  ;;  %v604_v22 = vadd.f32 %v1230_v11, %v603_v20  ;;  %v1288_v23 = vpop.f32.mrb[3].mxu0  ;;  %v851_v16 = vld [vmem:[#allocation2 + $0x8] sm:$0xff] }
 0x10f   : > { %v1248_v23 = vld [vmem:[%s1922_s8] ss:$0 sm:$0xff] (!%p1247_p1) }
 0x110   : > { %v727_v24 = vpack.c.bf16 %v604_v22, %v601_v18  ;;  %v738_v25 = vsel %vm733_vm3, %v728_v21, 0 }
 0x111   : > { %1306 = vmatpush3.bf16.xpose.msra.mxu1 %v738_v25 }
 0x112   : > { %1317 = vmatprep.subr.bf16.mxu1 %v1555_v2 }
 0x113   : > { %v720_v39 = vpop.f32.mrb[4].mxu0 }
 0x114   : > { %v721_v40 = vadd.f32 %v1239_v38, %v720_v39  ;;  %v1303_v41 = vpop.f32.mrb[5].mxu0 }
 0x115   : > { %v723_v42 = vpop.f32.mrb[6].mxu0 }
 0x116   : > { %v724_v43 = vadd.f32 %v1239_v38, %v723_v42  ;;  %v1304_v44 = vpop.f32.mrb[7].mxu0 }
 0x118   : > { %1308 = vmatmul.mubr.msk.bf16.vlgmr.msra.gmra.mrb[4].mxu1 %vm733_vm3, %v727_v24  ;;  %v801_v45 = vpack.c.bf16 %v724_v43, %v721_v40 }
 0x119   : > { %1319 = vmatprep.mubr.msk.bf16.mxu1 %vm1556_vm1, %v1555_v2  ;;  %1318 = vmatpush3.bf16.msra.mxu1 %v858_v47 }
 0x11a   : > { %1312 = vmatpush3.bf16.msra.mxu0 %v801_v45 }
 0x11b   : > { %1323 = vmatprep.subr.bf16.mxu0 %v1555_v2 }
 0x1eb   : > { %v774_v30 = vpop.f32.mrb[4].mxu1 }
 0x1ec   : > { %v775_v31 = vadd.f32 %v774_v30, %v732_v29  ;;  %v1309_v32 = vpop.f32.mrb[5].mxu1 }
 0x1ed   : > { %v777_v33 = vpop.f32.mrb[6].mxu1 }
 0x1ee   : > { %v778_v34 = vadd.f32 %v777_v33, %v732_v29  ;;  %v1310_v35 = vpop.f32.mrb[7].mxu1  ;;  %v782_v36 = vsel %vm781_vm5, %v775_v31, -inf }
 0x1ef   : > { %783 = vmax.xlane.f32.xlu0 %v782_v36 }
 0x1f0   : > { %v785_v37 = vsel %vm781_vm5, %v778_v34, -inf }
 0x1f3   : > { %786 = vmax.xlane.f32.xlu0 %v785_v37 }
 0x27c   : > { %v784_v48 = vpop.xlane.xlu0 %783 }
 0x27d   : > { %v788_v49 = vsub.f32 %v775_v31, %v784_v48 }
 0x27f   : > { %v790_v50 = vmul.f32 1.442695, %v788_v49 }
 0x280   : > { %v787_v51 = vpop.xlane.xlu0 %786 }
 0x281   : > { %1418 = vpow2.f32 %v790_v50  ;;  %v789_v52 = vsub.f32 %v778_v34, %v787_v51 }
 0x283   : > { %v792_v53 = vmul.f32 1.442695, %v789_v52 }
 0x285   : > { %1420 = vpow2.f32 %v792_v53 }
 0x28b   : > { %v1419_v54 = vpop.eup %1418 }
 0x28c   : > { %v794_v55 = vsel %vm781_vm5, %v1419_v54, 0.0 }
 0x28d   : > { %795 = vadd.xlane.f32.xlu1 %v794_v55 }
 0x28f   : > { %v1421_v56 = vpop.eup %1420 }
 0x290   : > { %v797_v57 = vsel %vm781_vm5, %v1421_v56, 0.0  ;;  %v800_v58 = vpack.c.bf16 %v1421_v56, %v1419_v54 }
 0x291   : > { %798 = vadd.xlane.f32.xlu1 %v797_v57 }
 0x292   : > { %1314 = vmatmul.mubr.msk.bf16.vlgmr.msra.gmra.mrb[8].mxu0 %vm781_vm5, %v800_v58 }
 0x293   : > { %1324 = vmatpush3.bf16.msra.mxu0 %v858_v47  ;;  %1325 = vmatprep.mubr.msk.bf16.mxu0 %vm1556_vm1, %v1555_v2  ;;  %v906_v2 = vld [vmem:[#allocation3 + $0x8] sm:$0xff] }
 0x29a   : > { %1326 = vmatmul.mubr.msk.bf16.vlgmr.msra.gmra.mrb[12].mxu0 %vm733_vm3, %v801_v45 }
 0x31a   : > { %v796_v59 = vpop.xlane.xlu1 %795 }
 0x31b   : > { %1422 = vrcp.f32 %v796_v59 }
 0x31e   : > { %v799_v60 = vpop.xlane.xlu1 %798 }
 0x31f   : > { %1424 = vrcp.f32 %v799_v60 }
 0x325   : > { %v1423_v62 = vpop.eup %1422 }
 0x329   : > { %v1425_v0 = vpop.eup %1424 }
 0x365   : > { %v839_v61 = vpop.f32.mrb[8].mxu0 }
 0x366   : > { %v1315_v63 = vpop.f32.mrb[9].mxu0  ;;  %v848_v3 = vmul.f32 %v1423_v62, %v839_v61 }
 0x367   : > { %v842_v1 = vpop.f32.mrb[10].mxu0 }
 0x368   : > { %v849_v4 = vmul.f32 %v1425_v0, %v842_v1  ;;  %v1316_v5 = vpop.f32.mrb[11].mxu0 }
 0x36a   : > { %v852_v6 = vpack.c.bf16 %v849_v4, %v848_v3 }
 0x36c   : > { %1320 = vmatmul.mubr.msk.bf16.vlgmr.msra.gmra.mrb[8].mxu1 %vm733_vm3, %v852_v6 }
 0x36d   : > { %v944_v8 = vpop.f32.mrb[12].mxu0 }
 0x36e   : > { %v951_v9 = vadd.f32 %v944_v8, %v905_v7  ;;  %v1327_v10 = vpop.f32.mrb[13].mxu0 }
 0x36f   : > { %v947_v11 = vpop.f32.mrb[14].mxu0 }
 0x370   : > { %953 = vst.msk [vmem:[#allocation3] sm:$0xff] %vm562_vm2, %v951_v9  ;;  %v952_v12 = vadd.f32 %v947_v11, %v906_v2  ;;  %v1328_v13 = vpop.f32.mrb[15].mxu0 }
 0x372   : > { %954 = vst.msk [vmem:[#allocation3 + $0x8] sm:$0xff] %vm562_vm2, %v952_v12 }
 0x377   : > { %v972_v27 = vld [vmem:[#allocation3] sm:$0xff] (!%p1247_p1) }
 0x378   : > { %v981_v29 = vadd.f32 (!%p1247_p1), %v1248_v23, %v972_v27 }
 0x379   : > { %v973_v28 = vld [vmem:[#allocation3 + $0x8] sm:$0xff] (!%p1247_p1) }
 0x37a   : > { %v982_v30 = vadd.f32 (!%p1247_p1), %v1248_v23, %v973_v28  ;;  %983 = vst.msk [vmem:[%s1735_s23] sm:$0xff] (!%p1247_p1), %vm562_vm2, %v981_v29 }
 0x37c   : > { %984 = vst.msk [vmem:[%s1735_s23 + $0x8] sm:$0xff] (!%p1247_p1), %vm562_vm2, %v982_v30 }
 0x43e   : > { %958 = sbr.rel (%p1247_p1) target bundleno = 1103 (0x44f), region = 64 }
 0x43f   : > { %v894_v15 = vpop.f32.mrb[8].mxu1 }
 0x440   : > { %v901_v17 = vadd.f32 %v894_v15, %v850_v14  ;;  %v1321_v18 = vpop.f32.mrb[9].mxu1 }
 0x441   : > { %v897_v19 = vpop.f32.mrb[10].mxu1 }
 0x442   : > { %903 = vst.msk [vmem:[#allocation2] sm:$0xff] %vm562_vm2, %v901_v17  ;;  %v902_v20 = vadd.f32 %v897_v19, %v851_v16  ;;  %v1322_v21 = vpop.f32.mrb[11].mxu1 }
 0x444   : > { %904 = vst.msk [vmem:[#allocation2 + $0x8] sm:$0xff] %vm562_vm2, %v902_v20 }
 0x449   : > { %v959_v22 = vld [vmem:[#allocation2] sm:$0xff] }
 0x44a   : > { %v968_v25 = vadd.f32 %v1248_v23, %v959_v22 }
 0x44b   : > { %v960_v24 = vld [vmem:[#allocation2 + $0x8] sm:$0xff] }
 0x44c   : > { %v969_v26 = vadd.f32 %v1248_v23, %v960_v24  ;;  %970 = vst.msk [vmem:[%s1733_s20] sm:$0xff] %vm562_vm2, %v968_v25 }
 0x44e   : > { %971 = vst.msk [vmem:[%s1733_s20 + $0x8] sm:$0xff] %vm562_vm2, %v969_v26 }
 0x44f PF: > { %s1262_s16 = sshll.u32 %s1540_s17, 8  ;;  %s1956_s12 = sld [smem:[#allocation23_spill]] }
 0x450   : > { %s1006_s22 = sshll.u32 %s1733_s20, 4  ;;  %s986_s28 = scalar_lea.sflag [#allocation5], %s1687_s30  ;;  %s1820_s22 = int_to_ptr.vmem [resolvable:$true] %s1006_s22 }
 0x451   : > { %s1426_s18 = scalar_lea.vmem %s1820_s22, 256  ;;  %s1558_s19 = smov [#allocation4]  }
 0x452   : > { %p1427_p2 = scmp.ne.s32.totalorder %s1820_s22, %s1426_s18  ;;  %s1430_s14 = sshll.u32 %s1558_s19, 4  ;;  %s1431_s14 = int_to_ptr.vmem [resolvable:$false] %s1430_s14 }
 0x453   : > { %s1432_s15 = scalar_lea.vmem %s1431_s14, 512  ;;  %p1433_p6 = scmp.lt.s32.totalorder %s1820_s22, %s1431_s14 }
 0x454   : > { %p1428_p4 = pnand %p1427_p2, %p1666_p3  ;;  %p1434_p7 = scmp.lt.s32.totalorder %s1432_s15, %s1426_s18 }
 0x455   : > { %s1817_s27 = scalar_lea.hbm %s1956_s12, %s1262_s16 }
 0x456   : > { %p1429_p5 = pneg %p1428_p4  ;;  %p1435_p8 = por %p1434_p7, %p1433_p6 }
 0x458   : > { %p1436_p10 = pnand %p1435_p8, %p1429_p5 }
 0x45a   : > { %1439 = shalt.err (!%p1436_p10)
}
 0x45b   : > { %s1440_s13 = scalar_lea.hbm %s1817_s27, 256  ;;  %s1444_s1 = scalar_lea.hbm %s1956_s12, 512 }
 0x45c   : > { %p1441_p11 = scmp.ne.s32.totalorder %s1817_s27, %s1440_s13  ;;  %p1445_p0 = scmp.lt.u32.totalorder %s1817_s27, %s1956_s12 }
 0x45d   : > { %p1446_p1 = scmp.lt.u32.totalorder %s1444_s1, %s1440_s13  ;;  %p1448_p4 = scmp.lt.u32.totalorder %s1440_s13, %s1817_s27 }
 0x45e   : > { %p1442_p12 = pnand %p1441_p11, %p1666_p3 }
 0x45f   : > { %p1447_p2 = por %p1446_p1, %p1445_p0 }
 0x460   : > { %p1443_p13 = pneg %p1442_p12 }
 0x461   : > { %p1449_p5 = por %p1448_p4, %p1447_p2 }
 0x463   : > { %p1450_p6 = pnand %p1449_p5, %p1443_p13 }
 0x465   : > { %1453 = shalt.err (!%p1450_p6)
}
 0x466   : > { %s1559_s10 = smov 128   ;;  %s1560_s24 = smov 8  }
 0x467   : > { %1329 = dma.vmem_to_hbm [thread:$0]  (%p1666_p3), %s1820_s22, 256, %s1817_s27, %s986_s28, %s1559_s10, %s1559_s10, %s1560_s24  }
 0x468   : > { %s1957_s11 = sld [smem:[#allocation24_spill]]  ;;  %s1024_s18 = sshll.u32 %s1735_s23, 4  ;;  %s1857_s18 = int_to_ptr.vmem [resolvable:$true] %s1024_s18 }
 0x469   : > { %s991_s19 = scalar_lea.sflag [#allocation7], %s1687_s30  ;;  %s1454_s14 = scalar_lea.vmem %s1857_s18, 256 }
 0x46a   : > { %p1455_p7 = scmp.ne.s32.totalorder %s1857_s18, %s1454_s14  ;;  %s1561_s15 = smov [#allocation6]  }
 0x46b   : > { %s1458_s27 = sshll.u32 %s1561_s15, 4  ;;  %s1459_s27 = int_to_ptr.vmem [resolvable:$false] %s1458_s27 }
 0x46c   : > { %p1456_p8 = pnand %p1455_p7, %p1666_p3  ;;  %s1460_s17 = scalar_lea.vmem %s1459_s27, 512 }
 0x46d   : > { %p1461_p11 = scmp.lt.s32.totalorder %s1857_s18, %s1459_s27  ;;  %p1462_p12 = scmp.lt.s32.totalorder %s1460_s17, %s1454_s14 }
 0x46e   : > { %s1854_s21 = scalar_lea.hbm %s1957_s11, %s1262_s16  ;;  %p1457_p10 = pneg %p1456_p8 }
 0x46f   : > { %p1463_p13 = por %p1462_p12, %p1461_p11 }
 0x471   : > { %p1464_p0 = pnand %p1463_p13, %p1457_p10 }
 0x473   : > { %1467 = shalt.err (!%p1464_p0)
}
 0x474   : > { %s1468_s23 = scalar_lea.hbm %s1854_s21, 256  ;;  %s1472_s28 = scalar_lea.hbm %s1957_s11, 512 }
 0x475   : > { %p1469_p1 = scmp.ne.s32.totalorder %s1854_s21, %s1468_s23  ;;  %p1473_p5 = scmp.lt.u32.totalorder %s1854_s21, %s1957_s11 }
 0x476   : > { %p1474_p6 = scmp.lt.u32.totalorder %s1472_s28, %s1468_s23  ;;  %p1476_p8 = scmp.lt.u32.totalorder %s1468_s23, %s1854_s21 }
 0x477   : > { %p1470_p2 = pnand %p1469_p1, %p1666_p3 }
 0x478   : > { %p1475_p7 = por %p1474_p6, %p1473_p5 }
 0x479   : > { %p1471_p4 = pneg %p1470_p2 }
 0x47a   : > { %p1477_p10 = por %p1476_p8, %p1475_p7 }
 0x47c   : > { %p1478_p11 = pnand %p1477_p10, %p1471_p4 }
 0x47e   : > { %1481 = shalt.err (!%p1478_p11)
}
 0x47f   : > { %1330 = dma.vmem_to_hbm [thread:$0]  (%p1666_p3), %s1857_s18, 256, %s1854_s21, %s991_s19, %s1559_s10, %s1559_s10, %s1560_s24  }
 0x480 PF: > { %s1958_s0 = sld [smem:[#allocation15_spill]]  ;;  %s1959_s1 = sld [smem:[#allocation10_spill]] }
 0x486   : > { %p1340_p12 = scmp.ge.s32.totalorder %s1958_s0, 2  ;;  %s1039_s9 = sand.u32 1, %s1959_s1  }
 0x487   : > { %s1040_s26 = scalar_lea.sflag [#allocation5], %s1039_s9 }
 0x488   : > { %p1334_p13 = pnand %p1340_p12, %p1676_p9 }
 0x48a   : > { %1515 = dma.done.wait (!%p1334_p13), %s1040_s26, 256  }
 0x48b   : > { %1517 = vsyncadd (!%p1334_p13), %s1040_s26, 4294967040  ;;  %s1049_s25 = scalar_lea.sflag [#allocation7], %s1039_s9 }
 0x48c   : > { %1519 = dma.done.wait (!%p1334_p13), %s1049_s25, 256  }
 0x48d   : > { %1521 = vsyncadd (!%p1334_p13), %s1049_s25, 4294967040  ;;  %s27_s20 = sadd.s32 1, %s1958_s0   ;;  %s1961_s13 = sld [smem:[#allocation11_spill]] }
 0x48e   : > { %p24_p0 = scmp.ge.s32.totalorder %s27_s20, 10   ;;  %s1962_s14 = sld [smem:[#allocation12_spill]] }
 0x48f   : > { %s1963_s15 = sld [smem:[#allocation19_spill]]  ;;  %s1964_s16 = sld [smem:[#allocation13_spill]] }
 0x490   : > { %s1965_s17 = sld [smem:[#allocation14_spill]]  ;;  %s1966_s18 = sld [smem:[#allocation16_spill]] }
 0x491   : > { %s1967_s19 = sld [smem:[#allocation17_spill]]  ;;  %26 = sbr.rel (!%p24_p0) target bundleno = 13 (0xd), region = 137 }
 0x498   :  { %1054 = vsyncpa [#allocation5], 1 }
 0x499   :  { %1056 = vsyncpa [#allocation5 + $0x1], 1 }
 0x49a   :  { %1057 = vsyncpa [#allocation7], 1 }
 0x49b   :  { %1059 = vsyncpa [#allocation7 + $0x1], 1 }

</bundles_post_ra>
